<compile_context>
chip_gen: v5e
topology: v5e:2x2
jax: 0.10.0
libtpu: 0.0.40
codegen_flags: <defaults>
</compile_context>

<pallas_src>
import functools

import jax
import jax.numpy as jnp
from jax import lax
from jax.experimental import pallas as pl
from jax.experimental.pallas import tpu as pltpu


# ----------------------------- Pallas kernels -------------------------------

def _qkv_proj_kernel(kx_ref, vx_ref, qx_ref, wt_ref, b_ref, o_ref):
    """Fused K/V/Q projections for one M-tile (distinct key/value/query inputs).

    kx/vx/qx: (tm, D) activations; wt: (3, D, D) pre-transposed weights (k, v, q);
    b: (3, 1, D) f32 biases; o: (3, tm, D) stacked projections.
    """
    for idx, x_ref in enumerate((kx_ref, vx_ref, qx_ref)):
        acc = jnp.dot(x_ref[...], wt_ref[idx],
                      preferred_element_type=jnp.float32) + b_ref[idx]
        o_ref[idx] = acc.astype(o_ref.dtype)


def _qkv_proj_self_kernel(x_ref, wcat_ref, bcat_ref, o_ref):
    """Self-attention fast path: one (tm, D) x (D, 3D) matmul -> (tm, 3D) [k|v|q]."""
    acc = jnp.dot(x_ref[...], wcat_ref[...],
                  preferred_element_type=jnp.float32) + bcat_ref[...]
    o_ref[...] = acc.astype(o_ref.dtype)


def _attention_kernel(q_ref, k_ref, v_ref, ctx_ref, attn_ref, *, scale):
    """All heads of one batch, one q-tile: q (H, tq, dph), k/v (H, L, dph)."""
    # Fold the scale into q: O(H*tq*dph) VPU multiplies instead of O(H*tq*L).
    q = q_ref[...] * scale
    k = k_ref[...]
    v = v_ref[...]
    # Batched contraction on the last axes -> no explicit k.T (no XLU transpose).
    s = jnp.einsum("hqd,hkd->hqk", q, k, preferred_element_type=jnp.float32)
    m = jnp.max(s, axis=-1, keepdims=True)
    e = jnp.exp(s - m)
    denom = jnp.sum(e, axis=-1, keepdims=True)
    inv = 1.0 / denom                      # exact per-row reciprocal: attn rows sum to 1
    attn = e * inv
    attn_ref[...] = attn.astype(attn_ref.dtype)
    ctx = jnp.einsum("hqk,hkd->hqd", attn.astype(v.dtype), v,
                     preferred_element_type=jnp.float32)
    ctx_ref[...] = ctx.astype(ctx_ref.dtype)


def _out_proj_ln_kernel(ctx_ref, res_ref, wt_ref, b_ref, g_ref, beta_ref, o_ref, *, eps):
    """Fused final projection + residual add + LayerNorm (one-pass stats)."""
    proj = jnp.dot(ctx_ref[...], wt_ref[...],
                   preferred_element_type=jnp.float32) + b_ref[...]
    y = proj + res_ref[...]
    d_inv = 1.0 / y.shape[-1]
    mean = jnp.sum(y, axis=-1, keepdims=True) * d_inv
    ex2 = jnp.sum(y * y, axis=-1, keepdims=True) * d_inv
    var = ex2 - mean * mean
    o_ref[...] = (y - mean) * lax.rsqrt(var + eps) * g_ref[...] + beta_ref[...]


# ----------------------------- tiling / VMEM helpers --------------------------

def _pick_m_tile(M, max_tile=512):
    """Largest multiple-of-8 divisor of M (<= max_tile) leaving >= 2 grid steps."""
    start = min(max_tile, M // 2)
    start -= start % 8
    for t in range(start, 7, -8):
        if M % t == 0:
            return t
    # TODO(synk): pad/mask awkward M instead of degenerating to grid=(1,).
    return M


def _pick_q_tile(B, L, H, dph, cd_bytes, attn_bytes, vmem_budget):
    """VMEM-budget-aware q-tile: largest multiple-of-8 divisor of L whose per-step
    footprint (double-buffered q/ctx/attn blocks + resident K/V) fits the budget."""
    start = min(512, L)
    start -= start % 8
    cands = [t for t in range(start, 7, -8) if L % t == 0] or [L]

    def est(tq):
        q_ctx = 2 * 2 * H * tq * dph * cd_bytes      # q in + ctx out (double-buffered)
        kv = 2 * 2 * H * L * dph * cd_bytes          # K + V (double-buffered)
        attn = 2 * H * tq * L * attn_bytes           # attn out (double-buffered)
        return q_ctx + kv + attn

    tq = cands[-1]
    for t in cands:
        if est(t) <= vmem_budget:
            tq = t
            break
    # v7x has 2 TensorCores: keep >= 2 steps on the parallel grid when possible.
    while B * (L // tq) < 2:
        smaller = [t for t in cands if t < tq]
        if not smaller:
            break
        tq = smaller[0]
    return tq, est(tq)


def _vmem_limit(estimate_bytes):
    # Generous headroom, capped at v7x's 64 MiB physical VMEM (safe on v5e/v6e too).
    return int(min(max(2 * estimate_bytes, 32 << 20), 64 << 20))


# ----------------------------- wrappers --------------------------------------

def prepare_params(params, compute_dtype=jnp.bfloat16):
    """Pre-transpose / pre-stack / pre-concatenate weights once, outside the kernels."""
    D = params["wk"].shape[0]
    cd = compute_dtype
    wk_t, wv_t, wq_t = params["wk"].T, params["wv"].T, params["wq"].T
    return {
        "wkvq_t": jnp.stack([wk_t, wv_t, wq_t]).astype(cd),                 # (3, D, D)
        "b_kvq": jnp.stack([params["bk"], params["bv"], params["bq"]])
                    .reshape(3, 1, D).astype(jnp.float32),
        "wkvq_cat": jnp.concatenate([wk_t, wv_t, wq_t], axis=1).astype(cd),  # (D, 3D)
        "b_cat": jnp.concatenate([params["bk"], params["bv"], params["bq"]])
                    .reshape(1, 3 * D).astype(jnp.float32),
        "wo_t": params["wo"].T.astype(cd),
        "bo": params["bo"].reshape(1, D).astype(jnp.float32),
        "gamma": params["gamma"].reshape(1, D).astype(jnp.float32),
        "beta": params["beta"].reshape(1, D).astype(jnp.float32),
    }


def multi_head_attention(key, value, query, prep, num_heads, *,
                         compute_dtype=jnp.bfloat16, attn_dtype=jnp.float32,
                         vmem_budget_bytes=48 << 20):
    """Forward pass of the PyTorch MultiHeadAttention module (eval mode)."""
    B, L, D = key.shape
    dph = D // num_heads
    M = B * L
    cd = compute_dtype
    cd_bytes = jnp.dtype(cd).itemsize
    attn_bytes = jnp.dtype(attn_dtype).itemsize

    if dph // num_heads <= 0:
        raise ValueError(
            "reference scale (dph // num_heads) ** -0.5 requires dim_per_head >= num_heads")

    tm = _pick_m_tile(M)
    self_attn = (key is value) and (value is query)

    # ---- 1) fused Q/K/V projections, tiled over M; weights single-buffered ---------
    if self_attn:
        x2d = query.reshape(M, D).astype(cd)
        est1 = (2 * tm * D * cd_bytes                  # activations (double-buffered)
                + 3 * D * D * cd_bytes + 3 * D * 4     # weights + bias (single-buffered)
                + 2 * tm * 3 * D * cd_bytes)           # output (double-buffered)
        kvq_cat = pl.pallas_call(
            _qkv_proj_self_kernel,
            out_shape=jax.ShapeDtypeStruct((M, 3 * D), cd),
            grid=(M // tm,),
            in_specs=[
                pl.BlockSpec((tm, D), lambda i: (i, 0)),
                pl.BlockSpec((D, 3 * D), lambda i: (0, 0),
                             pipeline_mode=pl.Buffered(1)),
                pl.BlockSpec((1, 3 * D), lambda i: (0, 0),
                             pipeline_mode=pl.Buffered(1)),
            ],
            out_specs=pl.BlockSpec((tm, 3 * D), lambda i: (i, 0)),
            compiler_params=pltpu.CompilerParams(
                dimension_semantics=("parallel",),
                vmem_limit_bytes=_vmem_limit(est1)),
            cost_estimate=pl.CostEstimate(
                flops=6 * M * D * D,
                transcendentals=0,
                bytes_accessed=M * D * cd_bytes + 3 * D * D * cd_bytes
                               + 3 * D * 4 + M * 3 * D * cd_bytes),
        )(x2d, prep["wkvq_cat"], prep["b_cat"])
        k2d = kvq_cat[:, 0 * D:1 * D]
        v2d = kvq_cat[:, 1 * D:2 * D]
        q2d = kvq_cat[:, 2 * D:3 * D]
    else:
        key2d = key.reshape(M, D).astype(cd)
        value2d = value.reshape(M, D).astype(cd)
        query2d = query.reshape(M, D).astype(cd)
        est1 = (3 * 2 * tm * D * cd_bytes
                + 3 * D * D * cd_bytes + 3 * D * 4
                + 2 * 3 * tm * D * cd_bytes)
        kvq = pl.pallas_call(
            _qkv_proj_kernel,
            out_shape=jax.ShapeDtypeStruct((3, M, D), cd),
            grid=(M // tm,),
            in_specs=[
                pl.BlockSpec((tm, D), lambda i: (i, 0)),              # key
                pl.BlockSpec((tm, D), lambda i: (i, 0)),              # value
                pl.BlockSpec((tm, D), lambda i: (i, 0)),              # query
                pl.BlockSpec((3, D, D), lambda i: (0, 0, 0),          # stacked w^T
                             pipeline_mode=pl.Buffered(1)),
                pl.BlockSpec((3, 1, D), lambda i: (0, 0, 0),          # stacked biases
                             pipeline_mode=pl.Buffered(1)),
            ],
            out_specs=pl.BlockSpec((3, tm, D), lambda i: (0, i, 0)),
            compiler_params=pltpu.CompilerParams(
                dimension_semantics=("parallel",),
                vmem_limit_bytes=_vmem_limit(est1)),
            cost_estimate=pl.CostEstimate(
                flops=6 * M * D * D,
                transcendentals=0,
                bytes_accessed=3 * M * D * cd_bytes + 3 * D * D * cd_bytes
                               + 3 * D * 4 + 3 * M * D * cd_bytes),
        )(key2d, value2d, query2d, prep["wkvq_t"], prep["b_kvq"])
        k2d, v2d, q2d = kvq[0], kvq[1], kvq[2]

    # torch: x.view(B*H, -1, dph) == contiguous reshape; grouped per batch here.
    kh = k2d.reshape(B, num_heads, L, dph)
    vh = v2d.reshape(B, num_heads, L, dph)
    qh = q2d.reshape(B, num_heads, L, dph)

    # torch: scale = (key.size(-1) // num_heads) ** (-0.5)   (quirky floor division)
    scale = float((dph // num_heads) ** (-0.5))

    # ---- 2) attention: all heads of a batch per step, VMEM-budget-aware q-tiling ---
    # TODO(synk): for very long L, add a kv grid axis (online/two-pass softmax) so K/V
    # and the attn block stay within VMEM independently of L.
    tq, est_attn = _pick_q_tile(B, L, num_heads, dph, cd_bytes, attn_bytes,
                                vmem_budget_bytes)
    kv_spec = pl.BlockSpec((None, num_heads, L, dph), lambda b, qi: (b, 0, 0, 0))
    ctx, attn = pl.pallas_call(
        functools.partial(_attention_kernel, scale=scale),
        out_shape=(
            jax.ShapeDtypeStruct((B, num_heads, L, dph), cd),
            jax.ShapeDtypeStruct((B, num_heads, L, L), attn_dtype),
        ),
        grid=(B, L // tq),
        in_specs=[
            pl.BlockSpec((None, num_heads, tq, dph), lambda b, qi: (b, 0, qi, 0)),
            kv_spec,
            kv_spec,
        ],
        out_specs=(
            pl.BlockSpec((None, num_heads, tq, dph), lambda b, qi: (b, 0, qi, 0)),
            pl.BlockSpec((None, num_heads, tq, L), lambda b, qi: (b, 0, qi, 0)),
        ),
        compiler_params=pltpu.CompilerParams(
            dimension_semantics=("parallel", "parallel"),
            vmem_limit_bytes=_vmem_limit(est_attn)),
        cost_estimate=pl.CostEstimate(
            flops=4 * B * num_heads * L * L * dph,
            transcendentals=B * num_heads * L * L,
            bytes_accessed=4 * B * num_heads * L * dph * cd_bytes
                           + B * num_heads * L * L * attn_bytes),
    )(qh, kh, vh)

    # torch: context.view(B, -1, dph*H)  -> contiguous reshape back to (M, D)
    ctx2d = ctx.reshape(M, D)
    res2d = query.reshape(M, D).astype(jnp.float32)

    # ---- 3) fused output projection + residual add + layernorm, tiled over M -------
    est3 = (2 * tm * D * cd_bytes + 2 * tm * D * 4
            + D * D * cd_bytes + 3 * D * 4 + 2 * tm * D * 4)
    out2d = pl.pallas_call(
        functools.partial(_out_proj_ln_kernel, eps=1e-5),
        out_shape=jax.ShapeDtypeStruct((M, D), jnp.float32),
        grid=(M // tm,),
        in_specs=[
            pl.BlockSpec((tm, D), lambda i: (i, 0)),                   # context
            pl.BlockSpec((tm, D), lambda i: (i, 0)),                   # residual (query)
            pl.BlockSpec((D, D), lambda i: (0, 0),                     # wo^T
                         pipeline_mode=pl.Buffered(1)),
            pl.BlockSpec((1, D), lambda i: (0, 0),                     # bo
                         pipeline_mode=pl.Buffered(1)),
            pl.BlockSpec((1, D), lambda i: (0, 0),                     # gamma
                         pipeline_mode=pl.Buffered(1)),
            pl.BlockSpec((1, D), lambda i: (0, 0),                     # beta
                         pipeline_mode=pl.Buffered(1)),
        ],
        out_specs=pl.BlockSpec((tm, D), lambda i: (i, 0)),
        compiler_params=pltpu.CompilerParams(
            dimension_semantics=("parallel",),
            vmem_limit_bytes=_vmem_limit(est3)),
        cost_estimate=pl.CostEstimate(
            flops=2 * M * D * D + 8 * M * D,
            transcendentals=M,
            bytes_accessed=M * D * cd_bytes + M * D * 4
                           + D * D * cd_bytes + 4 * D * 4 + M * D * 4),
    )(ctx2d, res2d, prep["wo_t"], prep["bo"], prep["gamma"], prep["beta"])

    return out2d.reshape(B, L, D), attn.reshape(B * num_heads, L, L)


# ----------------------------- reference (plain JAX, f32) ---------------------

def _reference(key, value, query, params, num_heads):
    B, L, D = key.shape
    dph = D // num_heads
    lin = lambda x, w, b: x @ w.T + b
    k = lin(key, params["wk"], params["bk"]).reshape(B * num_heads, -1, dph)
    v = lin(value, params["wv"], params["bv"]).reshape(B * num_heads, -1, dph)
    q = lin(query, params["wq"], params["bq"]).reshape(B * num_heads, -1, dph)
    scale = (dph // num_heads) ** (-0.5)
    s = jnp.einsum("bld,bmd->blm", q, k) * scale
    attn = jax.nn.softmax(s, axis=-1)
    ctx = jnp.einsum("blm,bmd->bld", attn, v).reshape(B, -1, D)
    out = lin(ctx, params["wo"], params["bo"])
    y = query + out
    mean = jnp.mean(y, axis=-1, keepdims=True)
    var = jnp.mean((y - mean) ** 2, axis=-1, keepdims=True)
    out = (y - mean) / jnp.sqrt(var + 1e-5) * params["gamma"] + params["beta"]
    return out, attn


# ----------------------------- main -------------------------------------------

if __name__ == "__main__":
    # Small but lane-dense shapes: last dims are 128 so stores are full-width.
    B, L, D, H = 2, 128, 128, 4          # dph = 32

    root = jax.random.PRNGKey(0)
    ks = jax.random.split(root, 11)

    key_in = jax.random.normal(ks[0], (B, L, D), jnp.float32)
    value_in = jax.random.normal(ks[1], (B, L, D), jnp.float32)
    query_in = jax.random.normal(ks[2], (B, L, D), jnp.float32)

    params = {
        "wk": 0.05 * jax.random.normal(ks[3], (D, D), jnp.float32),
        "bk": 0.05 * jax.random.normal(ks[4], (D,), jnp.float32),
        "wv": 0.05 * jax.random.normal(ks[5], (D, D), jnp.float32),
        "bv": 0.05 * jax.random.normal(ks[6], (D,), jnp.float32),
        "wq": 0.05 * jax.random.normal(ks[7], (D, D), jnp.float32),
        "bq": 0.05 * jax.random.normal(ks[8], (D,), jnp.float32),
        "wo": 0.05 * jax.random.normal(ks[9], (D, D), jnp.float32),
        "bo": 0.05 * jax.random.normal(ks[10], (D,), jnp.float32),
        "gamma": jnp.ones((D,), jnp.float32),
        "beta": jnp.zeros((D,), jnp.float32),
    }

    ref_out, ref_attn = _reference(key_in, value_in, query_in, params, H)

    # --- f32 compute path: tight check (exact softmax normalization) -----------------
    prep32 = prepare_params(params, jnp.float32)
    out32, attn32 = multi_head_attention(key_in, value_in, query_in, prep32, H,
                                         compute_dtype=jnp.float32,
                                         attn_dtype=jnp.float32)
    jax.block_until_ready((out32, attn32))
    assert out32.shape == (B, L, D) and attn32.shape == (B * H, L, L)
    assert jnp.allclose(out32, ref_out, rtol=5e-3, atol=5e-3)
    assert jnp.allclose(attn32, ref_attn, rtol=5e-3, atol=5e-3)

    # --- self-attention fast path (key is value is query): fused QKV matmul ----------
    ref_out_sa, ref_attn_sa = _reference(query_in, query_in, query_in, params, H)
    out_sa, attn_sa = multi_head_attention(query_in, query_in, query_in, prep32, H,
                                           compute_dtype=jnp.float32,
                                           attn_dtype=jnp.float32)
    jax.block_until_ready((out_sa, attn_sa))
    assert jnp.allclose(out_sa, ref_out_sa, rtol=5e-3, atol=5e-3)
    assert jnp.allclose(attn_sa, ref_attn_sa, rtol=5e-3, atol=5e-3)

    # --- bf16 MXU-operand default path (f32 accumulation/softmax/LN): loose check ----
    # NOTE: attn output is also bf16 here -- a visible precision change in a
    # user-facing output, enabled deliberately via attn_dtype.
    prep16 = prepare_params(params, jnp.bfloat16)
    out16, attn16 = multi_head_attention(key_in, value_in, query_in, prep16, H,
                                         compute_dtype=jnp.bfloat16,
                                         attn_dtype=jnp.bfloat16)
    jax.block_until_ready((out16, attn16))
    assert jnp.allclose(out16, ref_out, rtol=5e-2, atol=5e-2)
    assert jnp.allclose(attn16.astype(jnp.float32), ref_attn, rtol=5e-2, atol=5e-2)

    print("KERNEL_OK")
</pallas_src>

<mosaic_0001>
module attributes {stable_mosaic.version = 11 : i64} {
  func.func @_qkv_proj_kernel(%arg0: i32, %arg1: memref<128x128xf32, #tpu.memory_space<vmem>>, %arg2: memref<128x128xf32, #tpu.memory_space<vmem>>, %arg3: memref<128x128xf32, #tpu.memory_space<vmem>>, %arg4: memref<3x128x128xf32, #tpu.memory_space<vmem>>, %arg5: memref<3x1x128xf32, #tpu.memory_space<vmem>>, %arg6: memref<3x128x128xf32, #tpu.memory_space<vmem>>) attributes {dimension_semantics = [#tpu.dimension_semantics<parallel>], iteration_bounds = array<i64: 2>, scalar_prefetch = 0 : i64, scratch_operands = 0 : i64, tpu.core_type = #tpu.core_type<tc>, window_params = [{transform_indices = @transform_0, window_bounds = array<i64: 128, 128>}, {transform_indices = @transform_1, window_bounds = array<i64: 128, 128>}, {transform_indices = @transform_2, window_bounds = array<i64: 128, 128>}, {pipeline_mode = #tpu.pipeline_mode<synchronous>, transform_indices = @transform_3, window_bounds = array<i64: 3, 128, 128>}, {pipeline_mode = #tpu.pipeline_mode<synchronous>, transform_indices = @transform_4, window_bounds = array<i64: 3, 1, 128>}, {transform_indices = @transform_5, window_bounds = array<i64: 3, 128, 128>}]} {
    %c0 = arith.constant 0 : index
    %c0_0 = arith.constant 0 : index
    %0 = vector.load %arg1[%c0, %c0_0] : memref<128x128xf32, #tpu.memory_space<vmem>>, vector<128x128xf32>
    %c0_1 = arith.constant 0 : index
    %c0_2 = arith.constant 0 : index
    %c0_3 = arith.constant 0 : index
    %1 = vector.load %arg4[%c0_1, %c0_2, %c0_3] : memref<3x128x128xf32, #tpu.memory_space<vmem>>, vector<1x128x128xf32>
    %2 = vector.shape_cast %1 : vector<1x128x128xf32> to vector<128x128xf32>
    %cst = arith.constant dense<0.000000e+00> : vector<128x128xf32>
    %3 = tpu.matmul %0, %2, %cst {dimension_numbers = #tpu.dot_dimension_numbers<[1], [0], [0], [1], [0, 0, 1, 1], [], []>} : vector<128x128xf32>, vector<128x128xf32>, vector<128x128xf32> -> vector<128x128xf32>
    %c0_4 = arith.constant 0 : index
    %c0_5 = arith.constant 0 : index
    %c0_6 = arith.constant 0 : index
    %4 = vector.load %arg5[%c0_4, %c0_5, %c0_6] : memref<3x1x128xf32, #tpu.memory_space<vmem>>, vector<1x1x128xf32>
    %5 = vector.shape_cast %4 : vector<1x1x128xf32> to vector<1x128xf32>
    %6 = vector.broadcast %5 : vector<1x128xf32> to vector<128x128xf32>
    %7 = arith.addf %3, %6 : vector<128x128xf32>
    %c0_7 = arith.constant 0 : index
    %c0_8 = arith.constant 0 : index
    %c0_9 = arith.constant 0 : index
    %8 = vector.load %arg6[%c0_7, %c0_8, %c0_9] : memref<3x128x128xf32, #tpu.memory_space<vmem>>, vector<1x128x128xf32>
    %9 = vector.shape_cast %8 : vector<1x128x128xf32> to vector<128x128xf32>
    %10 = vector.shape_cast %7 : vector<128x128xf32> to vector<1x128x128xf32>
    tpu.vector_store %arg6[%c0_7, %c0_8, %c0_9], %10 {strides = array<i32>} : memref<3x128x128xf32, #tpu.memory_space<vmem>>, vector<1x128x128xf32>,
    %c0_10 = arith.constant 0 : index
    %c0_11 = arith.constant 0 : index
    %11 = vector.load %arg2[%c0_10, %c0_11] : memref<128x128xf32, #tpu.memory_space<vmem>>, vector<128x128xf32>
    %c1 = arith.constant 1 : index
    %c0_12 = arith.constant 0 : index
    %c0_13 = arith.constant 0 : index
    %12 = vector.load %arg4[%c1, %c0_12, %c0_13] : memref<3x128x128xf32, #tpu.memory_space<vmem>>, vector<1x128x128xf32>
    %13 = vector.shape_cast %12 : vector<1x128x128xf32> to vector<128x128xf32>
    %cst_14 = arith.constant dense<0.000000e+00> : vector<128x128xf32>
    %14 = tpu.matmul %11, %13, %cst_14 {dimension_numbers = #tpu.dot_dimension_numbers<[1], [0], [0], [1], [0, 0, 1, 1], [], []>} : vector<128x128xf32>, vector<128x128xf32>, vector<128x128xf32> -> vector<128x128xf32>
    %c1_15 = arith.constant 1 : index
    %c0_16 = arith.constant 0 : index
    %c0_17 = arith.constant 0 : index
    %15 = vector.load %arg5[%c1_15, %c0_16, %c0_17] : memref<3x1x128xf32, #tpu.memory_space<vmem>>, vector<1x1x128xf32>
    %16 = vector.shape_cast %15 : vector<1x1x128xf32> to vector<1x128xf32>
    %17 = vector.broadcast %16 : vector<1x128xf32> to vector<128x128xf32>
    %18 = arith.addf %14, %17 : vector<128x128xf32>
    %c1_18 = arith.constant 1 : index
    %c0_19 = arith.constant 0 : index
    %c0_20 = arith.constant 0 : index
    %19 = vector.load %arg6[%c1_18, %c0_19, %c0_20] : memref<3x128x128xf32, #tpu.memory_space<vmem>>, vector<1x128x128xf32>
    %20 = vector.shape_cast %19 : vector<1x128x128xf32> to vector<128x128xf32>
    %21 = vector.shape_cast %18 : vector<128x128xf32> to vector<1x128x128xf32>
    tpu.vector_store %arg6[%c1_18, %c0_19, %c0_20], %21 {strides = array<i32>} : memref<3x128x128xf32, #tpu.memory_space<vmem>>, vector<1x128x128xf32>,
    %c0_21 = arith.constant 0 : index
    %c0_22 = arith.constant 0 : index
    %22 = vector.load %arg3[%c0_21, %c0_22] : memref<128x128xf32, #tpu.memory_space<vmem>>, vector<128x128xf32>
    %c2 = arith.constant 2 : index
    %c0_23 = arith.constant 0 : index
    %c0_24 = arith.constant 0 : index
    %23 = vector.load %arg4[%c2, %c0_23, %c0_24] : memref<3x128x128xf32, #tpu.memory_space<vmem>>, vector<1x128x128xf32>
    %24 = vector.shape_cast %23 : vector<1x128x128xf32> to vector<128x128xf32>
    %cst_25 = arith.constant dense<0.000000e+00> : vector<128x128xf32>
    %25 = tpu.matmul %22, %24, %cst_25 {dimension_numbers = #tpu.dot_dimension_numbers<[1], [0], [0], [1], [0, 0, 1, 1], [], []>} : vector<128x128xf32>, vector<128x128xf32>, vector<128x128xf32> -> vector<128x128xf32>
    %c2_26 = arith.constant 2 : index
    %c0_27 = arith.constant 0 : index
    %c0_28 = arith.constant 0 : index
    %26 = vector.load %arg5[%c2_26, %c0_27, %c0_28] : memref<3x1x128xf32, #tpu.memory_space<vmem>>, vector<1x1x128xf32>
    %27 = vector.shape_cast %26 : vector<1x1x128xf32> to vector<1x128xf32>
    %28 = vector.broadcast %27 : vector<1x128xf32> to vector<128x128xf32>
    %29 = arith.addf %25, %28 : vector<128x128xf32>
    %c2_29 = arith.constant 2 : index
    %c0_30 = arith.constant 0 : index
    %c0_31 = arith.constant 0 : index
    %30 = vector.load %arg6[%c2_29, %c0_30, %c0_31] : memref<3x128x128xf32, #tpu.memory_space<vmem>>, vector<1x128x128xf32>
    %31 = vector.shape_cast %30 : vector<1x128x128xf32> to vector<128x128xf32>
    %32 = vector.shape_cast %29 : vector<128x128xf32> to vector<1x128x128xf32>
    tpu.vector_store %arg6[%c2_29, %c0_30, %c0_31], %32 {strides = array<i32>} : memref<3x128x128xf32, #tpu.memory_space<vmem>>, vector<1x128x128xf32>,
    return
  }
  func.func @transform_0(%arg0: i32) -> (i32, i32) {
    %c0_i32 = arith.constant 0 : i32
    %c0_i32_0 = arith.constant 0 : i32
    return %arg0, %c0_i32 : i32, i32
  }
  func.func @transform_1(%arg0: i32) -> (i32, i32) {
    %c0_i32 = arith.constant 0 : i32
    %c0_i32_0 = arith.constant 0 : i32
    return %arg0, %c0_i32 : i32, i32
  }
  func.func @transform_2(%arg0: i32) -> (i32, i32) {
    %c0_i32 = arith.constant 0 : i32
    %c0_i32_0 = arith.constant 0 : i32
    return %arg0, %c0_i32 : i32, i32
  }
  func.func @transform_3(%arg0: i32) -> (i32, i32, i32) {
    %c0_i32 = arith.constant 0 : i32
    %c0_i32_0 = arith.constant 0 : i32
    %c0_i32_1 = arith.constant 0 : i32
    %c0_i32_2 = arith.constant 0 : i32
    return %c0_i32, %c0_i32_0, %c0_i32_1 : i32, i32, i32
  }
  func.func @transform_4(%arg0: i32) -> (i32, i32, i32) {
    %c0_i32 = arith.constant 0 : i32
    %c0_i32_0 = arith.constant 0 : i32
    %c0_i32_1 = arith.constant 0 : i32
    %c0_i32_2 = arith.constant 0 : i32
    return %c0_i32, %c0_i32_0, %c0_i32_1 : i32, i32, i32
  }
  func.func @transform_5(%arg0: i32) -> (i32, i32, i32) {
    %c0_i32 = arith.constant 0 : i32
    %c0_i32_0 = arith.constant 0 : i32
    %c0_i32_1 = arith.constant 0 : i32
    return %c0_i32, %arg0, %c0_i32_0 : i32, i32, i32
  }
}

</mosaic_0001>

<bundles_post_ra>
// kernel: tpu_custom_call.1
= control target key start
LH: loop header
LB: loop body
LE: loop exit
PB: predicated region body
PF: predicated region fallthrough
CT: control target
= control target key end

     0   :  { %s1765_s0 = inlined_call_operand.hbm [shape: f32[256,128], index: 0, kind: input, shape index: {}]   ;;  %s1766_s1 = inlined_call_operand.hbm [shape: f32[256,128], index: 1, kind: input, shape index: {}]   ;;  %s1767_s2 = inlined_call_operand.hbm [shape: f32[256,128], index: 2, kind: input, shape index: {}]   ;;  %s1768_s3 = inlined_call_operand.hbm [shape: f32[3,128,128], index: 3, kind: input, shape index: {}]   ;;  %s1769_s4 = inlined_call_operand.vmem [shape: f32[3,1,128], index: 4, kind: input, shape index: {}]   ;;  %s1770_s5 = inlined_call_operand.hbm [shape: f32[3,256,128], index: 5, kind: output, shape index: {}]  }
   0x1   :  { %1777 = sst [smem:[#allocation20_spill]] %s1766_s1 }
   0x2   :  { %1778 = sst [smem:[#allocation21_spill]] %s1768_s3 }
   0x3   :  { %10 = vsyncpa [#allocation3], 0 }
   0x4   :  { %12 = vsyncpa [#allocation3 + $0x1], 0 }
   0x5   :  { %13 = vsyncpa [#allocation6], 0 }
   0x6   :  { %15 = vsyncpa [#allocation6 + $0x1], 0 }
   0x7   :  { %16 = vsyncpa [#allocation9], 0 }
   0x8   :  { %17 = vsyncpa [#allocation4], 0 }
   0x9   :  { %19 = vsyncpa [#allocation4 + $0x1], 0  ;;  %s1271_s18 = smov 0   ;;  %s1273_s19 = smov 0  }
   0xa   :  { %s1275_s20 = smov 0   ;;  %s1277_s21 = smov 0  }
   0xb LB: > { %1779 = sst [smem:[#allocation17_spill]] %s1229_s21  ;;  %s1292_s22 = sadd.s32 1, %s1229_s21   ;;  %s1229_s21 = sphi %s1277_s21, %s1793_s21   ;;  %s1225_s20 = sphi %s1275_s20, %s1797_s20   ;;  %s1221_s19 = sphi %s1273_s19, %s1796_s19   ;;  %s1217_s18 = sphi %s1271_s18, %s1795_s18  }
   0xc   : > { %1780 = sst [smem:[#allocation18_spill]] %s1292_s22  ;;  %s32_s23 = sadd.s32 1, %s1225_s20 }
   0xd   : > { %s29_s24 = ssub.s32 %s1229_s21, %s1292_s22  ;;  %p39_p0 = scmp.ne.s32.totalorder %s1225_s20, %s1221_s19 }
   0xe   : > { %p30_p1 = scmp.eq.s32.totalorder %s29_s24, 0  ;;  %p40_p2 = scmp.eq.s32.totalorder %s1229_s21, 0 }
   0xf   : > { %p1015_p5 = scmp.lt.s32.totalorder %s1229_s21, 2  ;;  %s1771_s26 = sand.u32 1, %s1225_s20  }
  0x10   : > { %s1301_s25 = scalar_select %p30_p1, %s1225_s20, %s32_s23  }
  0x11   : > { %p41_p3 = por %p40_p2, %p39_p0  ;;  %s1311_s27 = sshll.u32 %s1771_s26, 7 }
  0x12   : > { %1781 = sst [smem:[#allocation19_spill]] %s1301_s25  ;;  %s1314_s28 = sshll.u32 %s1229_s21, 7 }
  0x13   : > { %p1316_p6 = pnand %p1015_p5, %p41_p3  ;;  %s228_s30 = sand.u32 1, %s1229_s21  }
  0x14   : > { %s1783_s1 = sld [smem:[#allocation20_spill]]  ;;  %s232_s10 = scalar_lea.vmem [#allocation5], %s1311_s27 }
  0x15   : > { %s240_s11 = sshll.u32 %s232_s10, 4  ;;  %s1326_s12 = scalar_lea.sflag [#allocation6], %s228_s30  ;;  %s241_s11 = int_to_ptr.vmem [resolvable:$true] %s240_s11 }
  0x16   : > { %p1067_p8 = pneg %p1316_p6 }
  0x1a   : > { %s237_s8 = scalar_lea.hbm %s1783_s1, %s1314_s28  ;;  %s1070_s17 = scalar_lea.hbm %s1783_s1, 256 }
  0x1b   : > { %s238_s9 = sshll.u32 %s237_s8, 4  ;;  %s239_s9 = int_to_ptr.hbm [resolvable:$true] %s238_s9 }
  0x1c   : > { %s1063_s13 = sshra.s32 %s239_s9, 4  ;;  %s1064_s13 = int_to_ptr.hbm [resolvable:$true] %s1063_s13 }
  0x1d   : > { %s1065_s14 = scalar_lea.hbm %s1064_s13, 128  ;;  %p1071_p11 = scmp.lt.s32.totalorder %s1064_s13, %s1783_s1 }
  0x1e   : > { %p1066_p7 = scmp.ne.s32.totalorder %s1064_s13, %s1065_s14  ;;  %p1072_p12 = scmp.lt.s32.totalorder %s1070_s17, %s1065_s14 }
  0x20   : > { %p1068_p9 = pnand %p1067_p8, %p1066_p7  ;;  %p1073_p13 = por %p1072_p12, %p1071_p11 }
  0x22   : > { %p1069_p10 = pneg %p1068_p9 }
  0x24   : > { %p1074_p1 = pnand %p1073_p13, %p1069_p10 }
  0x26   : > { %1077 = shalt.err (!%p1074_p1)
}
  0x27   : > { %s1772_s30 = smov 128   ;;  %s1232_s6 = smov 8  }
  0x28   : > { %1006 = dma.hbm_to_vmem [thread:$0]  (!%p1316_p6), %s239_s9, 2048, %s241_s11, %s1326_s12, %s1772_s30, %s1772_s30, %s1232_s6  }
  0x29   : > { %s1346_s7 = sadd.s32 4294967295, %s1229_s21   ;;  %s869_s8 = sadd.s32 4294967294, %s1229_s21  }
  0x2a   : > { %p45_p2 = scmp.ne.s32.totalorder %s1221_s19, %s1217_s18  ;;  %p46_p3 = scmp.eq.s32.totalorder %s1346_s7, 0 }
  0x2b   : > { %p163_p5 = scmp.eq.s32.totalorder %s1346_s7, 1  ;;  %p169_p7 = scmp.eq.s32.totalorder %s869_s8, 1 }
  0x2c   : > { %p1355_p9 = por %p46_p3, %p45_p2  ;;  %p870_p10 = scmp.ge.s32.totalorder %s1229_s21, 1 }
  0x2d   : > { %p1363_p11 = por %p163_p5, %p39_p0  ;;  %p1367_p12 = por %p169_p7, %p45_p2 }
  0x2e   : > { %p176_p13 = scmp.lt.s32.totalorder %s1229_s21, 3  ;;  %s1787_s3 = sld [smem:[#allocation21_spill]] }
  0x2f   : > { %s1233_s17 = smov [#allocation8]   ;;  %s215_s26 = scalar_lea.hbm %s1765_s0, %s1314_s28 }
  0x30   : > { %p1375_p1 = pnand %p870_p10, %p176_p13  ;;  %s189_s23 = sshll.u32 %s1233_s17, 4  ;;  %s190_s23 = int_to_ptr.vmem [resolvable:$true] %s189_s23 }
  0x31   : > { %s216_s13 = sshll.u32 %s215_s26, 4  ;;  %s210_s14 = scalar_lea.vmem [#allocation2], %s1311_s27  ;;  %s217_s13 = int_to_ptr.hbm [resolvable:$true] %s216_s13 }
  0x32   : > { %p996_p0 = pneg %p1375_p1  ;;  %s218_s30 = sshll.u32 %s210_s14, 4  ;;  %s219_s30 = int_to_ptr.vmem [resolvable:$true] %s218_s30 }
  0x33   : > { %s1789_s1 = smov 128   ;;  %s1790_s17 = sand.u32 1, %s1225_s20  }
  0x34   : > { %s187_s15 = sshll.u32 %s1787_s3, 4  ;;  %p997_p2 = pnand %p996_p0, %p46_p3  ;;  %s188_s15 = int_to_ptr.hbm [resolvable:$true] %s187_s15 }
  0x35   : > { %s207_s3 = scalar_lea.sflag [#allocation3], %s1790_s17  ;;  %s1123_s25 = sshra.s32 %s217_s13, 4  ;;  %s1124_s25 = int_to_ptr.hbm [resolvable:$true] %s1123_s25 }
  0x36   : > { %999 = dma.hbm_to_vmem [thread:$0]  (!%p997_p2), %s188_s15, 6144, %s190_s23, [#allocation9], %s1789_s1, %s1789_s1, %s1232_s6  }
  0x37   : > { %s1125_s22 = scalar_lea.hbm %s1124_s25, 128  ;;  %s1130_s8 = scalar_lea.hbm %s1765_s0, 256 }
  0x38   : > { %p1126_p5 = scmp.ne.s32.totalorder %s1124_s25, %s1125_s22  ;;  %p1131_p13 = scmp.lt.s32.totalorder %s1124_s25, %s1765_s0 }
  0x39   : > { %p1132_p0 = scmp.lt.s32.totalorder %s1130_s8, %s1125_s22 }
  0x3a   : > { %p1128_p7 = pnand %p1126_p5, %p1067_p8 }
  0x3b   : > { %p1133_p2 = por %p1132_p0, %p1131_p13 }
  0x3c   : > { %p1129_p10 = pneg %p1128_p7 }
  0x3e   : > { %p1134_p4 = pnand %p1133_p2, %p1129_p10 }
  0x40   : > { %1137 = shalt.err (!%p1134_p4)
}
  0x41   : > { %1003 = dma.hbm_to_vmem [thread:$0]  (!%p1316_p6), %s217_s13, 2048, %s219_s30, %s207_s3, %s1789_s1, %s1789_s1, %s1232_s6  }
  0x42   : > { %s259_s17 = scalar_lea.hbm %s1767_s2, %s1314_s28  ;;  %s254_s21 = scalar_lea.vmem [#allocation7], %s1311_s27 }
  0x43   : > { %s260_s24 = sshll.u32 %s259_s17, 4  ;;  %s262_s25 = sshll.u32 %s254_s21, 4  ;;  %s261_s24 = int_to_ptr.hbm [resolvable:$true] %s260_s24  ;;  %s263_s25 = int_to_ptr.vmem [resolvable:$true] %s262_s25 }
  0x44   : > { %s1153_s22 = sshra.s32 %s261_s24, 4  ;;  %s1160_s3 = scalar_lea.hbm %s1767_s2, 256  ;;  %s1154_s22 = int_to_ptr.hbm [resolvable:$true] %s1153_s22 }
  0x45   : > { %s1155_s26 = scalar_lea.hbm %s1154_s22, 128  ;;  %p1161_p10 = scmp.lt.s32.totalorder %s1154_s22, %s1767_s2 }
  0x46   : > { %p1156_p4 = scmp.ne.s32.totalorder %s1154_s22, %s1155_s26  ;;  %p1162_p13 = scmp.lt.s32.totalorder %s1160_s3, %s1155_s26 }
  0x48   : > { %p1158_p5 = pnand %p1156_p4, %p1067_p8  ;;  %p1163_p0 = por %p1162_p13, %p1161_p10 }
  0x4a   : > { %p1159_p7 = pneg %p1158_p5 }
  0x4c   : > { %p1164_p2 = pnand %p1163_p0, %p1159_p7 }
  0x4e   : > { %1167 = shalt.err (!%p1164_p2)
}
  0x4f   : > { %1009 = dma.hbm_to_vmem [thread:$0]  (!%p1316_p6), %s261_s24, 2048, %s263_s25, %s1326_s12, %s1789_s1, %s1789_s1, %s1232_s6  }
  0x50   : > { %274 = sbr.rel (%p1375_p1) target bundleno = 357 (0x165), region = 40  ;;  %s1430_s27 = sand.u32 (!%p1375_p1), 1, %s1221_s19  }
  0x51   : > { %s883_s28 = sshll.u32 (!%p1375_p1), %s1430_s27, 7  ;;  %s277_s15 = scalar_lea.sflag (!%p1375_p1), [#allocation3], %s1430_s27 }
  0x52   : > { %s1434_s23 = scalar_lea.vmem (!%p1375_p1), [#allocation2], %s883_s28 }
  0x55   : > { %1200 = dma.done.wait (%p1355_p9), %s277_s15, 2048  }
  0x56   : > { %1202 = vsyncadd (%p1355_p9), %s277_s15, 4294965248  ;;  %s286_s1 = sand.u32 1, %s1346_s7   ;;  %s1441_s12 = scalar_lea.vmem [#allocation5], %s883_s28 }
  0x57   : > { %s287_s29 = scalar_lea.sflag [#allocation6], %s286_s1 }
  0x58   : > { %1204 = dma.done.wait (%p1355_p9), %s287_s29, 4096  }
  0x59   : > { %1206 = vsyncadd (%p1355_p9), %s287_s29, 4294963200  ;;  %s1447_s6 = scalar_lea.vmem [#allocation7], %s883_s28 }
  0x5a   : > { %1208 = dma.done.wait (%p46_p3), [#allocation9], 6144  }
  0x5b   : > { %1210 = vsyncadd (%p46_p3), [#allocation9], 4294961152  ;;  %v378_v0 = vld [vmem:[#allocation8 + $0x78] sm:$0xff]  ;;  %v377_v2 = vld [vmem:[#allocation8 + $0x70] sm:$0xff]  ;;  %s977_s10 = smul.u32 384, %s1430_s27  ;;  %s705_s8 = scalar_lea.sflag [#allocation4], %s1430_s27 }
  0x5c   : > { %v1453_v1 = vld [vmem:[#allocation8 + $0x178] sm:$0xff]  ;;  %929 = vmatpush.msra.mxu3 %v378_v0  ;;  %v1456_v3 = vld [vmem:[#allocation8 + $0x170] sm:$0xff]  ;;  %v376_v4 = vld [vmem:[#allocation8 + $0x68] sm:$0xff]  ;;  %383 = vmatpush.msra.mxu0 %v378_v0 }
  0x5d   : > { %622 = vmatpush.msra.mxu2 %v1453_v1  ;;  %v1458_v5 = vld [vmem:[#allocation8 + $0x168] sm:$0xff]  ;;  %v1460_v6 = vld [vmem:[#allocation8 + $0xf8] sm:$0xff]  ;;  %v1463_v7 = vld [vmem:[#allocation8 + $0xf0] sm:$0xff]  ;;  %s1631_s26 = scalar_lea.vmem [#allocation10], %s977_s10 }
  0x5e   : > { %930 = vmatpush.msra.mxu3 %v377_v2  ;;  %v375_v8 = vld [vmem:[#allocation8 + $0x60] sm:$0xff]  ;;  %502 = vmatpush.msra.mxu1 %v1460_v6  ;;  %v1469_v10 = vld [vmem:[#allocation8 + $0xe8] sm:$0xff]  ;;  %v374_v11 = vld [vmem:[#allocation8 + $0x58] sm:$0xff] }
  0x5f   : > { %623 = vmatpush.msra.mxu2 %v1456_v3  ;;  %v1466_v9 = vld [vmem:[#allocation8 + $0x160] sm:$0xff]  ;;  %384 = vmatpush.msra.mxu0 %v377_v2  ;;  %v1472_v12 = vld [vmem:[#allocation8 + $0x158] sm:$0xff]  ;;  %v373_v14 = vld [vmem:[#allocation8 + $0x50] sm:$0xff] }
  0x60   : > { %931 = vmatpush.msra.mxu3 %v376_v4  ;;  %503 = vmatpush.msra.mxu1 %v1463_v7  ;;  %v1475_v13 = vld [vmem:[#allocation8 + $0xe0] sm:$0xff]  ;;  %v1478_v15 = vld [vmem:[#allocation8 + $0x150] sm:$0xff]  ;;  %v1481_v16 = vld [vmem:[#allocation8 + $0xd8] sm:$0xff] }
  0x61   : > { %624 = vmatpush.msra.mxu2 %v1458_v5  ;;  %385 = vmatpush.msra.mxu0 %v376_v4  ;;  %v372_v17 = vld [vmem:[#allocation8 + $0x48] sm:$0xff]  ;;  %v1487_v19 = vld [vmem:[#allocation8 + $0xd0] sm:$0xff]  ;;  %v371_v20 = vld [vmem:[#allocation8 + $0x40] sm:$0xff] }
  0x62   : > { %932 = vmatpush.msra.mxu3 %v375_v8  ;;  %504 = vmatpush.msra.mxu1 %v1469_v10  ;;  %v1484_v18 = vld [vmem:[#allocation8 + $0x148] sm:$0xff]  ;;  %v1490_v21 = vld [vmem:[#allocation8 + $0x140] sm:$0xff]  ;;  %v370_v23 = vld [vmem:[#allocation8 + $0x38] sm:$0xff] }
  0x63   : > { %625 = vmatpush.msra.mxu2 %v1466_v9  ;;  %386 = vmatpush.msra.mxu0 %v375_v8  ;;  %v1493_v22 = vld [vmem:[#allocation8 + $0xc8] sm:$0xff]  ;;  %v1496_v24 = vld [vmem:[#allocation8 + $0x138] sm:$0xff]  ;;  %v1499_v25 = vld [vmem:[#allocation8 + $0xc0] sm:$0xff] }
  0x64   : > { %933 = vmatpush.msra.mxu3 %v374_v11  ;;  %505 = vmatpush.msra.mxu1 %v1475_v13  ;;  %v369_v26 = vld [vmem:[#allocation8 + $0x30] sm:$0xff]  ;;  %v1505_v28 = vld [vmem:[#allocation8 + $0xb8] sm:$0xff]  ;;  %v368_v29 = vld [vmem:[#allocation8 + $0x28] sm:$0xff] }
  0x65   : > { %626 = vmatpush.msra.mxu2 %v1472_v12  ;;  %387 = vmatpush.msra.mxu0 %v374_v11  ;;  %v1502_v27 = vld [vmem:[#allocation8 + $0x130] sm:$0xff]  ;;  %v1508_v30 = vld [vmem:[#allocation8 + $0x128] sm:$0xff]  ;;  %v367_v32 = vld [vmem:[#allocation8 + $0x20] sm:$0xff] }
  0x66   : > { %934 = vmatpush.msra.mxu3 %v373_v14  ;;  %506 = vmatpush.msra.mxu1 %v1481_v16  ;;  %v1511_v31 = vld [vmem:[#allocation8 + $0xb0] sm:$0xff]  ;;  %v1514_v33 = vld [vmem:[#allocation8 + $0x120] sm:$0xff]  ;;  %v1517_v34 = vld [vmem:[#allocation8 + $0xa8] sm:$0xff] }
  0x67   : > { %627 = vmatpush.msra.mxu2 %v1478_v15  ;;  %388 = vmatpush.msra.mxu0 %v373_v14  ;;  %v366_v35 = vld [vmem:[#allocation8 + $0x18] sm:$0xff]  ;;  %v1523_v37 = vld [vmem:[#allocation8 + $0xa0] sm:$0xff]  ;;  %v365_v38 = vld [vmem:[#allocation8 + $0x10] sm:$0xff] }
  0x68   : > { %935 = vmatpush.msra.mxu3 %v372_v17  ;;  %507 = vmatpush.msra.mxu1 %v1487_v19  ;;  %v1520_v36 = vld [vmem:[#allocation8 + $0x118] sm:$0xff]  ;;  %v1526_v39 = vld [vmem:[#allocation8 + $0x110] sm:$0xff]  ;;  %v364_v41 = vld [vmem:[#allocation8 + $0x8] sm:$0xff] }
  0x69   : > { %628 = vmatpush.msra.mxu2 %v1484_v18  ;;  %389 = vmatpush.msra.mxu0 %v372_v17  ;;  %v484_v40 = vld [vmem:[#allocation8 + $0x98] sm:$0xff]  ;;  %v1530_v42 = vld [vmem:[#allocation8 + $0x108] sm:$0xff]  ;;  %v483_v43 = vld [vmem:[#allocation8 + $0x90] sm:$0xff] }
  0x6a   : > { %936 = vmatpush.msra.mxu3 %v371_v20  ;;  %508 = vmatpush.msra.mxu1 %v1493_v22  ;;  %v363_v44 = vld [vmem:[#allocation8] sm:$0xff]  ;;  %v482_v48 = vld [vmem:[#allocation8 + $0x88] sm:$0xff]  ;;  %v361_v56 = vld [vmem:[%s1434_s23 + $0x70] sm:$0xff] }
  0x6b   : > { %629 = vmatpush.msra.mxu2 %v1490_v21  ;;  %390 = vmatpush.msra.mxu0 %v371_v20  ;;  %v1533_v45 = vld [vmem:[#allocation8 + $0x100] sm:$0xff]  ;;  %v360_v52 = vld [vmem:[%s1434_s23 + $0x68] sm:$0xff]  ;;  %v586_v57 = vld [vmem:[%s1447_s6 + $0x10] sm:$0xff] }
  0x6c   : > { %937 = vmatpush.msra.mxu3 %v370_v23  ;;  %509 = vmatpush.msra.mxu1 %v1499_v25  ;;  %v359_v46 = vld [vmem:[%s1434_s23 + $0x60] sm:$0xff]  ;;  %v585_v53 = vld [vmem:[%s1447_s6 + $0x8] sm:$0xff]  ;;  %v349_v58 = vld [vmem:[%s1434_s23 + $0x10] sm:$0xff] }
  0x6d   : > { %630 = vmatpush.msra.mxu2 %v1496_v24  ;;  %391 = vmatpush.msra.mxu0 %v370_v23  ;;  %v584_v47 = vld [vmem:[%s1447_s6] sm:$0xff]  ;;  %v348_v54 = vld [vmem:[%s1434_s23 + $0x8] sm:$0xff]  ;;  %v466_v59 = vld [vmem:[%s1441_s12 + $0x10] sm:$0xff] }
  0x6e   : > { %938 = vmatpush.msra.mxu3 %v369_v26  ;;  %510 = vmatpush.msra.mxu1 %v1505_v28  ;;  %v481_v49 = vld [vmem:[#allocation8 + $0x80] sm:$0xff]  ;;  %v465_v55 = vld [vmem:[%s1441_s12 + $0x8] sm:$0xff]  ;;  %v362_v60 = vld [vmem:[%s1434_s23 + $0x78] sm:$0xff] }
  0x6f   : > { %631 = vmatpush.msra.mxu2 %v1502_v27  ;;  %392 = vmatpush.msra.mxu0 %v369_v26  ;;  %v347_v50 = vld [vmem:[%s1434_s23] sm:$0xff]  ;;  %v587_v61 = vld [vmem:[%s1447_s6 + $0x18] sm:$0xff]  ;;  %v589_v8 = vld [vmem:[%s1447_s6 + $0x28] sm:$0xff] }
  0x70   : > { %939 = vmatpush.msra.mxu3 %v368_v29  ;;  %511 = vmatpush.msra.mxu1 %v1511_v31  ;;  %v464_v51 = vld [vmem:[%s1441_s12] sm:$0xff]  ;;  %v350_v62 = vld [vmem:[%s1434_s23 + $0x18] sm:$0xff]  ;;  %v470_v11 = vld [vmem:[%s1441_s12 + $0x30] sm:$0xff] }
  0x71   : > { %632 = vmatpush.msra.mxu2 %v1508_v30  ;;  %393 = vmatpush.msra.mxu0 %v368_v29  ;;  %v467_v63 = vld [vmem:[%s1441_s12 + $0x18] sm:$0xff]  ;;  %v476_v0 = vld [vmem:[%s1441_s12 + $0x60] sm:$0xff]  ;;  %v593_v20 = vld [vmem:[%s1447_s6 + $0x48] sm:$0xff] }
  0x72   : > { %940 = vmatpush.msra.mxu3 %v367_v32  ;;  %512 = vmatpush.msra.mxu1 %v1517_v34  ;;  %v588_v2 = vld [vmem:[%s1447_s6 + $0x20] sm:$0xff]  ;;  %v354_v14 = vld [vmem:[%s1434_s23 + $0x38] sm:$0xff]  ;;  %v473_v23 = vld [vmem:[%s1441_s12 + $0x48] sm:$0xff] }
  0x73   : > { %633 = vmatpush.msra.mxu2 %v1514_v33  ;;  %394 = vmatpush.msra.mxu0 %v367_v32  ;;  %v351_v4 = vld [vmem:[%s1434_s23 + $0x20] sm:$0xff]  ;;  %v357_v26 = vld [vmem:[%s1434_s23 + $0x50] sm:$0xff]  ;;  %v599_v29 = vld [vmem:[%s1447_s6 + $0x78] sm:$0xff] }
  0x74   : > { %941 = vmatpush.msra.mxu3 %v366_v35  ;;  %513 = vmatpush.msra.mxu1 %v1523_v37  ;;  %v596_v17 = vld [vmem:[%s1447_s6 + $0x60] sm:$0xff] }
  0x75   : > { %634 = vmatpush.msra.mxu2 %v1520_v36  ;;  %395 = vmatpush.msra.mxu0 %v366_v35  ;;  %v1617_v32 = vld [vmem:[%s1769_s4] ss:$0 sm:$0xff] }
  0x76   : > { %942 = vmatpush.msra.mxu3 %v365_v38  ;;  %514 = vmatpush.msra.mxu1 %v484_v40 }
  0x77   : > { %635 = vmatpush.msra.mxu2 %v1526_v39  ;;  %396 = vmatpush.msra.mxu0 %v365_v38 }
  0x78   : > { %943 = vmatpush.msra.mxu3 %v364_v41  ;;  %515 = vmatpush.msra.mxu1 %v483_v43 }
  0x79   : > { %636 = vmatpush.msra.mxu2 %v1530_v42  ;;  %397 = vmatpush.msra.mxu0 %v364_v41 }
  0x7a   : > { %944 = vmatpush.msra.mxu3 %v363_v44  ;;  %516 = vmatpush.msra.mxu1 %v482_v48 }
  0x7b   : > { %637 = vmatpush.msra.mxu2 %v1533_v45  ;;  %435 = vmatmul.f32.vlgmr.msra.gmra.mxu3 %v359_v46 }
  0x7c   : > { %638 = vmatmul.f32.vlgmr.msra.gmra.mxu2 %v584_v47  ;;  %945 = vmatpush.msrb.mxu3 %v1460_v6  ;;  %v468_v6 = vld [vmem:[%s1441_s12 + $0x20] sm:$0xff] }
  0x7d   : > { %398 = vmatpush.msra.mxu0 %v363_v44  ;;  %517 = vmatpush.msra.mxu1 %v481_v49 }
  0x7e   : > { %946 = vmatpush.msrb.mxu3 %v1463_v7  ;;  %399 = vmatmul.f32.vlgmr.msra.gmra.mxu0 %v347_v50  ;;  %v477_v7 = vld [vmem:[%s1441_s12 + $0x68] sm:$0xff] }
  0x7f   : > { %518 = vmatmul.f32.vlgmr.msra.gmra.mxu1 %v464_v51 }
  0x80   : > { %947 = vmatpush.msrb.mxu3 %v1469_v10  ;;  %v469_v10 = vld [vmem:[%s1441_s12 + $0x28] sm:$0xff] }
  0x82   : > { %948 = vmatpush.msrb.mxu3 %v1475_v13  ;;  %v591_v13 = vld [vmem:[%s1447_s6 + $0x38] sm:$0xff] }
  0x83   : > { %438 = vmatmul.f32.gmra.mxu3 %v360_v52 }
  0x84   : > { %641 = vmatmul.f32.gmra.mxu2 %v585_v53  ;;  %949 = vmatpush.msrb.mxu3 %v1481_v16  ;;  %v592_v16 = vld [vmem:[%s1447_s6 + $0x40] sm:$0xff] }
  0x86   : > { %950 = vmatpush.msrb.mxu3 %v1487_v19  ;;  %402 = vmatmul.f32.gmra.mxu0 %v348_v54  ;;  %v472_v19 = vld [vmem:[%s1441_s12 + $0x40] sm:$0xff] }
  0x87   : > { %521 = vmatmul.f32.gmra.mxu1 %v465_v55 }
  0x88   : > { %951 = vmatpush.msrb.mxu3 %v1493_v22  ;;  %v356_v22 = vld [vmem:[%s1434_s23 + $0x48] sm:$0xff] }
  0x8a   : > { %952 = vmatpush.msrb.mxu3 %v1499_v25  ;;  %v598_v25 = vld [vmem:[%s1447_s6 + $0x70] sm:$0xff] }
  0x8b   : > { %441 = vmatmul.f32.gmra.mxu3 %v361_v56 }
  0x8c   : > { %644 = vmatmul.f32.gmra.mxu2 %v586_v57  ;;  %953 = vmatpush.msrb.mxu3 %v1505_v28  ;;  %v595_v28 = vld [vmem:[%s1447_s6 + $0x58] sm:$0xff] }
  0x8e   : > { %954 = vmatpush.msrb.mxu3 %v1511_v31  ;;  %405 = vmatmul.f32.gmra.mxu0 %v349_v58  ;;  %v475_v31 = vld [vmem:[%s1441_s12 + $0x58] sm:$0xff] }
  0x8f   : > { %524 = vmatmul.f32.gmra.mxu1 %v466_v59 }
  0x90   : > { %955 = vmatpush.msrb.mxu3 %v1517_v34  ;;  %v1627_v34 = vld [vmem:[%s1769_s4 + $0x2] ss:$0 sm:$0xff] }
  0x92   : > { %956 = vmatpush.msrb.mxu3 %v1523_v37 }
  0x93   : > { %444 = vmatmul.f32.gmra.mxu3 %v362_v60 }
  0x94   : > { %647 = vmatmul.f32.gmra.mxu2 %v587_v61  ;;  %957 = vmatpush.msrb.mxu3 %v484_v40 }
  0x96   : > { %958 = vmatpush.msrb.mxu3 %v483_v43  ;;  %408 = vmatmul.f32.gmra.mxu0 %v350_v62 }
  0x97   : > { %527 = vmatmul.f32.gmra.mxu1 %v467_v63 }
  0x98   : > { %959 = vmatpush.msrb.mxu3 %v482_v48 }
  0x9a   : > { %960 = vmatpush.msrb.mxu3 %v481_v49 }
  0x9b   : > { %554 = vmatmul.f32.vlgmr.msrb.gmra.mxu3 %v476_v0 }
  0x9c   : > { %650 = vmatmul.f32.gmra.mxu2 %v588_v2  ;;  %961 = vmatpush.msra.mxu3 %v1453_v1  ;;  %v352_v1 = vld [vmem:[%s1434_s23 + $0x28] sm:$0xff] }
  0x9e   : > { %962 = vmatpush.msra.mxu3 %v1456_v3  ;;  %411 = vmatmul.f32.gmra.mxu0 %v351_v4  ;;  %v478_v3 = vld [vmem:[%s1441_s12 + $0x70] sm:$0xff] }
  0x9f   : > { %530 = vmatmul.f32.gmra.mxu1 %v468_v6 }
  0xa0   : > { %963 = vmatpush.msra.mxu3 %v1458_v5  ;;  %v590_v5 = vld [vmem:[%s1447_s6 + $0x30] sm:$0xff] }
  0xa2   : > { %964 = vmatpush.msra.mxu3 %v1466_v9  ;;  %v353_v9 = vld [vmem:[%s1434_s23 + $0x30] sm:$0xff] }
  0xa3   : > { %557 = vmatmul.f32.gmra.mxu3 %v477_v7 }
  0xa4   : > { %653 = vmatmul.f32.gmra.mxu2 %v589_v8  ;;  %965 = vmatpush.msra.mxu3 %v1472_v12  ;;  %v479_v12 = vld [vmem:[%s1441_s12 + $0x78] sm:$0xff] }
  0xa6   : > { %966 = vmatpush.msra.mxu3 %v1478_v15  ;;  %414 = vmatmul.f32.gmra.mxu0 %v352_v1  ;;  %v471_v15 = vld [vmem:[%s1441_s12 + $0x38] sm:$0xff] }
  0xa7   : > { %533 = vmatmul.f32.gmra.mxu1 %v469_v10 }
  0xa8   : > { %967 = vmatpush.msra.mxu3 %v1484_v18  ;;  %v355_v18 = vld [vmem:[%s1434_s23 + $0x40] sm:$0xff] }
  0xaa   : > { %968 = vmatpush.msra.mxu3 %v1490_v21  ;;  %v597_v21 = vld [vmem:[%s1447_s6 + $0x68] sm:$0xff] }
  0xab   : > { %560 = vmatmul.f32.gmra.mxu3 %v478_v3 }
  0xac   : > { %656 = vmatmul.f32.gmra.mxu2 %v590_v5  ;;  %969 = vmatpush.msra.mxu3 %v1496_v24  ;;  %v594_v24 = vld [vmem:[%s1447_s6 + $0x50] sm:$0xff] }
  0xae   : > { %970 = vmatpush.msra.mxu3 %v1502_v27  ;;  %417 = vmatmul.f32.gmra.mxu0 %v353_v9  ;;  %v474_v27 = vld [vmem:[%s1441_s12 + $0x50] sm:$0xff] }
  0xaf   : > { %536 = vmatmul.f32.gmra.mxu1 %v470_v11 }
  0xb0   : > { %971 = vmatpush.msra.mxu3 %v1508_v30  ;;  %v358_v30 = vld [vmem:[%s1434_s23 + $0x58] sm:$0xff] }
  0xb2   : > { %972 = vmatpush.msra.mxu3 %v1514_v33  ;;  %v1622_v33 = vld [vmem:[%s1769_s4 + $0x1] ss:$0 sm:$0xff] }
  0xb3   : > { %563 = vmatmul.f32.gmra.mxu3 %v479_v12 }
  0xb4   : > { %659 = vmatmul.f32.gmra.mxu2 %v591_v13  ;;  %973 = vmatpush.msra.mxu3 %v1520_v36 }
  0xb6   : > { %974 = vmatpush.msra.mxu3 %v1526_v39  ;;  %420 = vmatmul.f32.gmra.mxu0 %v354_v14 }
  0xb7   : > { %539 = vmatmul.f32.gmra.mxu1 %v471_v15 }
  0xb8   : > { %975 = vmatpush.msra.mxu3 %v1530_v42 }
  0xba   : > { %976 = vmatpush.msra.mxu3 %v1533_v45 }
  0xbb   : > { %674 = vmatmul.f32.vlgmr.msra.gmra.mxu3 %v596_v17 }
  0xbc   : > { %662 = vmatmul.f32.gmra.mxu2 %v592_v16 }
  0xbe   : > { %423 = vmatmul.f32.gmra.mxu0 %v355_v18 }
  0xbf   : > { %542 = vmatmul.f32.gmra.mxu1 %v472_v19 }
  0xc3   : > { %677 = vmatmul.f32.gmra.mxu3 %v597_v21 }
  0xc4   : > { %665 = vmatmul.f32.gmra.mxu2 %v593_v20 }
  0xc6   : > { %426 = vmatmul.f32.gmra.mxu0 %v356_v22 }
  0xc7   : > { %545 = vmatmul.f32.gmra.mxu1 %v473_v23 }
  0xcb   : > { %680 = vmatmul.f32.gmra.mxu3 %v598_v25 }
  0xcc   : > { %668 = vmatmul.f32.gmra.mxu2 %v594_v24 }
  0xce   : > { %429 = vmatmul.f32.gmra.mxu0 %v357_v26 }
  0xcf   : > { %548 = vmatmul.f32.gmra.mxu1 %v474_v27 }
  0xd3   : > { %683 = vmatmul.f32.gmra.mxu3 %v599_v29 }
  0xd4   : > { %671 = vmatmul.f32.gmra.mxu2 %v595_v28 }
  0xd6   : > { %432 = vmatmul.f32.gmra.mxu0 %v358_v30 }
  0xd7   : > { %551 = vmatmul.f32.gmra.mxu1 %v475_v31 }
  0xfb   : > { %v400_v35 = vpop.f32.mrf.mxu0 }
  0xfc   : > { %v519_v36 = vpop.f32.mrf.mxu1  ;;  %v401_v37 = vadd.f32 %v1617_v32, %v400_v35 }
  0xfd   : > { %v520_v38 = vadd.f32 %v1622_v33, %v519_v36 }
  0xfe   : > { %v436_v39 = vpop.f32.mrf.mxu3  ;;  %448 = vst [vmem:[%s1631_s26] sm:$0xff] %v401_v37 }
  0xff   : > { %v639_v40 = vpop.f32.mrf.mxu2  ;;  %v437_v41 = vadd.f32 %v1617_v32, %v436_v39  ;;  %888 = vst [vmem:[%s1631_s26 + $0x80] sm:$0xff] %v520_v38 }
 0x100   : > { %v640_v42 = vadd.f32 %v1627_v34, %v639_v40 }
 0x101   : > { %460 = vst [vmem:[%s1631_s26 + $0x60] sm:$0xff] %v437_v41 }
 0x102   : > { %905 = vst [vmem:[%s1631_s26 + $0x100] sm:$0xff] %v640_v42 }
 0x103   : > { %v403_v43 = vpop.f32.mrf.mxu0 }
 0x104   : > { %v522_v44 = vpop.f32.mrf.mxu1  ;;  %v404_v45 = vadd.f32 %v1617_v32, %v403_v43 }
 0x105   : > { %v523_v46 = vadd.f32 %v1622_v33, %v522_v44 }
 0x106   : > { %v439_v47 = vpop.f32.mrf.mxu3  ;;  %449 = vst [vmem:[%s1631_s26 + $0x8] sm:$0xff] %v404_v45 }
 0x107   : > { %v642_v48 = vpop.f32.mrf.mxu2  ;;  %v440_v49 = vadd.f32 %v1617_v32, %v439_v47  ;;  %889 = vst [vmem:[%s1631_s26 + $0x88] sm:$0xff] %v523_v46 }
 0x108   : > { %v643_v50 = vadd.f32 %v1627_v34, %v642_v48 }
 0x109   : > { %461 = vst [vmem:[%s1631_s26 + $0x68] sm:$0xff] %v440_v49 }
 0x10a   : > { %906 = vst [vmem:[%s1631_s26 + $0x108] sm:$0xff] %v643_v50 }
 0x10b   : > { %v406_v51 = vpop.f32.mrf.mxu0 }
 0x10c   : > { %v525_v52 = vpop.f32.mrf.mxu1  ;;  %v407_v53 = vadd.f32 %v1617_v32, %v406_v51 }
 0x10d   : > { %v526_v54 = vadd.f32 %v1622_v33, %v525_v52 }
 0x10e   : > { %v442_v55 = vpop.f32.mrf.mxu3  ;;  %450 = vst [vmem:[%s1631_s26 + $0x10] sm:$0xff] %v407_v53 }
 0x10f   : > { %v645_v56 = vpop.f32.mrf.mxu2  ;;  %v443_v57 = vadd.f32 %v1617_v32, %v442_v55  ;;  %890 = vst [vmem:[%s1631_s26 + $0x90] sm:$0xff] %v526_v54 }
 0x110   : > { %v646_v58 = vadd.f32 %v1627_v34, %v645_v56 }
 0x111   : > { %462 = vst [vmem:[%s1631_s26 + $0x70] sm:$0xff] %v443_v57 }
 0x112   : > { %907 = vst [vmem:[%s1631_s26 + $0x110] sm:$0xff] %v646_v58 }
 0x113   : > { %v409_v59 = vpop.f32.mrf.mxu0 }
 0x114   : > { %v528_v60 = vpop.f32.mrf.mxu1  ;;  %v410_v61 = vadd.f32 %v1617_v32, %v409_v59 }
 0x115   : > { %v529_v62 = vadd.f32 %v1622_v33, %v528_v60 }
 0x116   : > { %v445_v63 = vpop.f32.mrf.mxu3  ;;  %451 = vst [vmem:[%s1631_s26 + $0x18] sm:$0xff] %v410_v61 }
 0x117   : > { %v648_v0 = vpop.f32.mrf.mxu2  ;;  %v446_v2 = vadd.f32 %v1617_v32, %v445_v63  ;;  %891 = vst [vmem:[%s1631_s26 + $0x98] sm:$0xff] %v529_v62 }
 0x118   : > { %v649_v4 = vadd.f32 %v1627_v34, %v648_v0 }
 0x119   : > { %463 = vst [vmem:[%s1631_s26 + $0x78] sm:$0xff] %v446_v2 }
 0x11a   : > { %908 = vst [vmem:[%s1631_s26 + $0x118] sm:$0xff] %v649_v4 }
 0x11b   : > { %v412_v6 = vpop.f32.mrf.mxu0 }
 0x11c   : > { %v531_v7 = vpop.f32.mrf.mxu1  ;;  %v413_v8 = vadd.f32 %v1617_v32, %v412_v6 }
 0x11d   : > { %v532_v1 = vadd.f32 %v1622_v33, %v531_v7 }
 0x11e   : > { %v555_v10 = vpop.f32.mrf.mxu3  ;;  %452 = vst [vmem:[%s1631_s26 + $0x20] sm:$0xff] %v413_v8 }
 0x11f   : > { %v651_v3 = vpop.f32.mrf.mxu2  ;;  %v556_v5 = vadd.f32 %v1622_v33, %v555_v10  ;;  %892 = vst [vmem:[%s1631_s26 + $0xa0] sm:$0xff] %v532_v1 }
 0x120   : > { %v652_v9 = vadd.f32 %v1627_v34, %v651_v3 }
 0x121   : > { %900 = vst [vmem:[%s1631_s26 + $0xe0] sm:$0xff] %v556_v5 }
 0x122   : > { %909 = vst [vmem:[%s1631_s26 + $0x120] sm:$0xff] %v652_v9 }
 0x123   : > { %v415_v11 = vpop.f32.mrf.mxu0 }
 0x124   : > { %v534_v12 = vpop.f32.mrf.mxu1  ;;  %v416_v13 = vadd.f32 %v1617_v32, %v415_v11 }
 0x125   : > { %v535_v14 = vadd.f32 %v1622_v33, %v534_v12 }
 0x126   : > { %v558_v15 = vpop.f32.mrf.mxu3  ;;  %453 = vst [vmem:[%s1631_s26 + $0x28] sm:$0xff] %v416_v13 }
 0x127   : > { %v654_v16 = vpop.f32.mrf.mxu2  ;;  %v559_v17 = vadd.f32 %v1622_v33, %v558_v15  ;;  %893 = vst [vmem:[%s1631_s26 + $0xa8] sm:$0xff] %v535_v14 }
 0x128   : > { %v655_v18 = vadd.f32 %v1627_v34, %v654_v16 }
 0x129   : > { %901 = vst [vmem:[%s1631_s26 + $0xe8] sm:$0xff] %v559_v17 }
 0x12a   : > { %910 = vst [vmem:[%s1631_s26 + $0x128] sm:$0xff] %v655_v18 }
 0x12b   : > { %v418_v19 = vpop.f32.mrf.mxu0 }
 0x12c   : > { %v537_v20 = vpop.f32.mrf.mxu1  ;;  %v419_v21 = vadd.f32 %v1617_v32, %v418_v19 }
 0x12d   : > { %v538_v22 = vadd.f32 %v1622_v33, %v537_v20 }
 0x12e   : > { %v561_v23 = vpop.f32.mrf.mxu3  ;;  %454 = vst [vmem:[%s1631_s26 + $0x30] sm:$0xff] %v419_v21 }
 0x12f   : > { %v657_v24 = vpop.f32.mrf.mxu2  ;;  %v562_v25 = vadd.f32 %v1622_v33, %v561_v23  ;;  %894 = vst [vmem:[%s1631_s26 + $0xb0] sm:$0xff] %v538_v22 }
 0x130   : > { %v658_v26 = vadd.f32 %v1627_v34, %v657_v24 }
 0x131   : > { %902 = vst [vmem:[%s1631_s26 + $0xf0] sm:$0xff] %v562_v25 }
 0x132   : > { %911 = vst [vmem:[%s1631_s26 + $0x130] sm:$0xff] %v658_v26 }
 0x133   : > { %v421_v27 = vpop.f32.mrf.mxu0 }
 0x134   : > { %v540_v28 = vpop.f32.mrf.mxu1  ;;  %v422_v29 = vadd.f32 %v1617_v32, %v421_v27 }
 0x135   : > { %v541_v30 = vadd.f32 %v1622_v33, %v540_v28 }
 0x136   : > { %v564_v31 = vpop.f32.mrf.mxu3  ;;  %455 = vst [vmem:[%s1631_s26 + $0x38] sm:$0xff] %v422_v29 }
 0x137   : > { %v660_v35 = vpop.f32.mrf.mxu2  ;;  %v565_v36 = vadd.f32 %v1622_v33, %v564_v31  ;;  %895 = vst [vmem:[%s1631_s26 + $0xb8] sm:$0xff] %v541_v30 }
 0x138   : > { %v661_v37 = vadd.f32 %v1627_v34, %v660_v35 }
 0x139   : > { %903 = vst [vmem:[%s1631_s26 + $0xf8] sm:$0xff] %v565_v36 }
 0x13a   : > { %912 = vst [vmem:[%s1631_s26 + $0x138] sm:$0xff] %v661_v37 }
 0x13b   : > { %v424_v38 = vpop.f32.mrf.mxu0 }
 0x13c   : > { %v543_v39 = vpop.f32.mrf.mxu1  ;;  %v425_v40 = vadd.f32 %v1617_v32, %v424_v38 }
 0x13d   : > { %v544_v41 = vadd.f32 %v1622_v33, %v543_v39 }
 0x13e   : > { %v675_v43 = vpop.f32.mrf.mxu3  ;;  %456 = vst [vmem:[%s1631_s26 + $0x40] sm:$0xff] %v425_v40 }
 0x13f   : > { %v663_v42 = vpop.f32.mrf.mxu2  ;;  %v676_v45 = vadd.f32 %v1627_v34, %v675_v43  ;;  %896 = vst [vmem:[%s1631_s26 + $0xc0] sm:$0xff] %v544_v41 }
 0x140   : > { %v664_v44 = vadd.f32 %v1627_v34, %v663_v42 }
 0x141   : > { %917 = vst [vmem:[%s1631_s26 + $0x160] sm:$0xff] %v676_v45 }
 0x142   : > { %913 = vst [vmem:[%s1631_s26 + $0x140] sm:$0xff] %v664_v44 }
 0x143   : > { %v427_v46 = vpop.f32.mrf.mxu0 }
 0x144   : > { %v546_v47 = vpop.f32.mrf.mxu1  ;;  %v428_v48 = vadd.f32 %v1617_v32, %v427_v46 }
 0x145   : > { %v547_v49 = vadd.f32 %v1622_v33, %v546_v47 }
 0x146   : > { %v678_v51 = vpop.f32.mrf.mxu3  ;;  %457 = vst [vmem:[%s1631_s26 + $0x48] sm:$0xff] %v428_v48 }
 0x147   : > { %v666_v50 = vpop.f32.mrf.mxu2  ;;  %v679_v53 = vadd.f32 %v1627_v34, %v678_v51  ;;  %897 = vst [vmem:[%s1631_s26 + $0xc8] sm:$0xff] %v547_v49 }
 0x148   : > { %v667_v52 = vadd.f32 %v1627_v34, %v666_v50 }
 0x149   : > { %918 = vst [vmem:[%s1631_s26 + $0x168] sm:$0xff] %v679_v53 }
 0x14a   : > { %914 = vst [vmem:[%s1631_s26 + $0x148] sm:$0xff] %v667_v52 }
 0x14b   : > { %v430_v54 = vpop.f32.mrf.mxu0 }
 0x14c   : > { %v549_v55 = vpop.f32.mrf.mxu1  ;;  %v431_v56 = vadd.f32 %v1617_v32, %v430_v54 }
 0x14d   : > { %v550_v57 = vadd.f32 %v1622_v33, %v549_v55 }
 0x14e   : > { %v681_v59 = vpop.f32.mrf.mxu3  ;;  %458 = vst [vmem:[%s1631_s26 + $0x50] sm:$0xff] %v431_v56 }
 0x14f   : > { %v669_v58 = vpop.f32.mrf.mxu2  ;;  %v682_v61 = vadd.f32 %v1627_v34, %v681_v59  ;;  %898 = vst [vmem:[%s1631_s26 + $0xd0] sm:$0xff] %v550_v57 }
 0x150   : > { %v670_v60 = vadd.f32 %v1627_v34, %v669_v58 }
 0x151   : > { %919 = vst [vmem:[%s1631_s26 + $0x170] sm:$0xff] %v682_v61 }
 0x152   : > { %915 = vst [vmem:[%s1631_s26 + $0x150] sm:$0xff] %v670_v60 }
 0x153   : > { %v433_v62 = vpop.f32.mrf.mxu0 }
 0x154   : > { %v552_v63 = vpop.f32.mrf.mxu1  ;;  %v434_v0 = vadd.f32 %v1617_v32, %v433_v62 }
 0x155   : > { %v553_v2 = vadd.f32 %v1622_v33, %v552_v63 }
 0x156   : > { %v684_v6 = vpop.f32.mrf.mxu3  ;;  %459 = vst [vmem:[%s1631_s26 + $0x58] sm:$0xff] %v434_v0 }
 0x157   : > { %v672_v4 = vpop.f32.mrf.mxu2  ;;  %v685_v8 = vadd.f32 %v1627_v34, %v684_v6  ;;  %899 = vst [vmem:[%s1631_s26 + $0xd8] sm:$0xff] %v553_v2 }
 0x158   : > { %v673_v7 = vadd.f32 %v1627_v34, %v672_v4 }
 0x159   : > { %920 = vst [vmem:[%s1631_s26 + $0x178] sm:$0xff] %v685_v8 }
 0x15a   : > { %916 = vst [vmem:[%s1631_s26 + $0x158] sm:$0xff] %v673_v7 }
 0x15b   : > { %s928_s14 = sshll.u32 %s1346_s7, 7  ;;  %s727_s3 = sshll.u32 %s1631_s26, 4  ;;  %s728_s3 = int_to_ptr.vmem [resolvable:$true] %s727_s3 }
 0x15c   : > { %s716_s28 = scalar_lea.hbm %s1770_s5, %s928_s14  ;;  %s1234_s23 = smov 2048  }
 0x15d   : > { %s729_s15 = sshll.u32 %s716_s28, 4  ;;  %988 = sst [smem:[#allocation12]] (%p1363_p11), %s1234_s23  ;;  %s730_s15 = int_to_ptr.hbm [resolvable:$true] %s729_s15 }
 0x15e   : > { %s1235_s27 = smov 4096   ;;  %s1236_s1 = smov 16  }
 0x15f   : > { %989 = sst [smem:[#allocation12 + $0x1]] (%p1363_p11), %s1235_s27  ;;  %s1237_s7 = smov 128  }
 0x160   : > { %990 = sst [smem:[#allocation12 + $0x2]] (%p1363_p11), %s1236_s1  ;;  %s1238_s29 = smov 8  }
 0x161   : > { %991 = sst [smem:[#allocation12 + $0x3]] (%p1363_p11), %s1237_s7  ;;  %s1239_s12 = smov [#allocation11]  }
 0x162   : > { %992 = sst [smem:[#allocation12 + $0x4]] (%p1363_p11), %s1237_s7  ;;  %s1240_s6 = smov 0  }
 0x163   : > { %993 = sst [smem:[#allocation12 + $0x5]] (%p1363_p11), %s1238_s29 }
 0x164   : > { %994 = dma.general (%p1363_p11), %s728_s3, 6144, %s730_s15, %s705_s8, %s1239_s12, [#allocation12], %s1240_s6, 0  }
 0x165 PF: > { %s1791_s10 = sld [smem:[#allocation17_spill]]  ;;  %s757_s16 = sand.u32 1, %s1217_s18  }
 0x166   : > { %s758_s17 = scalar_lea.sflag [#allocation4], %s757_s16 }
 0x16b   : > { %p1792_p6 = scmp.ge.s32.totalorder %s1791_s10, 2 }
 0x16d   : > { %p1011_p8 = pnand %p1792_p6, %p1367_p12 }
 0x16f   : > { %p1012_p3 = pneg %p1011_p8 }
 0x171   : > { %1212 = dma.done.wait (%p1012_p3), %s758_s17, 6144  }
 0x172   : > { %1214 = vsyncadd (%p1012_p3), %s758_s17, 4294961152  ;;  %s1793_s21 = sld [smem:[#allocation18_spill]]  ;;  %s1795_s18 = smov %s1221_s19 }
 0x173   : > { %s1794_s24 = sld [smem:[#allocation19_spill]]  ;;  %s1796_s19 = smov %s1225_s20 }
 0x178   : > { %p22_p9 = scmp.ge.s32.totalorder %s1793_s21, 4  }
 0x179   : > { %s1797_s20 = smov %s1794_s24 }
 0x17a   :  { %24 = sbr.rel (!%p22_p9) target bundleno = 11 (0xb), region = 124 }
 0x17f   :  { %764 = vsyncpa [#allocation3], 1 }
 0x180   :  { %766 = vsyncpa [#allocation3 + $0x1], 1 }
 0x181   :  { %767 = vsyncpa [#allocation6], 1 }
 0x182   :  { %769 = vsyncpa [#allocation6 + $0x1], 1 }
 0x183   :  { %770 = vsyncpa [#allocation9], 1 }
 0x184   :  { %771 = vsyncpa [#allocation4], 1 }
 0x185   :  { %773 = vsyncpa [#allocation4 + $0x1], 1 }

</bundles_post_ra>
